<compile_context>
chip_gen: v5e
topology: v5e:2x2
jax: 0.10.0
libtpu: 0.0.40
codegen_flags: <defaults>
</compile_context>

<pallas_src>
import functools

import jax
import jax.numpy as jnp
from jax.experimental import pallas as pl
from jax.experimental.pallas import tpu as pltpu

WIN_SIZE = 11
WIN_SIGMA = 1.5
K1, K2 = 0.01, 0.03


def _round_up(x, m):
    return ((x + m - 1) // m) * m


def _gauss_1d(size=WIN_SIZE, sigma=WIN_SIGMA):
    coords = jnp.arange(size, dtype=jnp.float32) - size // 2
    g = jnp.exp(-(coords ** 2) / (2.0 * sigma ** 2))
    return g / jnp.sum(g)


def _conv_matrices(H, W, HOp, WQ):
    """Zero-padded Toeplitz matrices for the separable valid gaussian filter.

    a_h: (HOp, H) with a_h[o, h] = g[h - o] for 0 <= h - o < WIN and o < Ho.
    a_w: (W, WQ)  with a_w[w, q] = g[w - q] for 0 <= w - q < WIN and q < Wo.
    Padded rows/cols (o >= Ho, q >= Wo) are exactly zero, so padded cells of the
    filtered maps are exactly zero.
    """
    g = _gauss_1d()
    Ho, Wo = H - WIN_SIZE + 1, W - WIN_SIZE + 1

    o = jnp.arange(HOp)[:, None]
    h = jnp.arange(H)[None, :]
    d = h - o
    a_h = jnp.where((d >= 0) & (d < WIN_SIZE) & (o < Ho),
                    g[jnp.clip(d, 0, WIN_SIZE - 1)], 0.0)

    w = jnp.arange(W)[:, None]
    q = jnp.arange(WQ)[None, :]
    d = w - q
    a_w = jnp.where((d >= 0) & (d < WIN_SIZE) & (q < Wo),
                    g[jnp.clip(d, 0, WIN_SIZE - 1)], 0.0)
    return a_h.astype(jnp.float32), a_w.astype(jnp.float32)


def _ssim_kernel(x_ref, y_ref, ah_ref, aw_ref, o_ref, *, c1, c2, ho, wo, hop, wq, p):
    x = x_ref[...].astype(jnp.float32)            # (P, H, W), native dtype in
    y = y_ref[...].astype(jnp.float32)            # (P, H, W)
    ah = ah_ref[...]                              # (HOp, H)
    aw = aw_ref[...]                              # (W, WQ)

    # Single small broadcast of the H-stage filter; the same traced value is
    # reused by all five component filters (one broadcast op per grid step).
    ah_b = jnp.broadcast_to(ah[None], (p,) + ah.shape)           # (P, HOp, H)

    def gfilt(z):
        # Height stage first: reduce rows H -> HOp before the lane-padded WQ
        # dimension ever appears (big MXU-FLOP saving when Wo < 128).
        t = jnp.einsum('poh,phw->pow', ah_b, z,
                       preferred_element_type=jnp.float32)       # (P, HOp, W)
        # Width stage as one collapsed 2-D MXU matmul; reshapes are free
        # leading-dim merges/splits (HOp % 8 == 0, WQ % 128 == 0).
        f = jnp.dot(t.reshape(p * hop, t.shape[-1]), aw,
                    preferred_element_type=jnp.float32)          # (P*HOp, WQ)
        return f.reshape(p, hop, wq)

    mu1 = gfilt(x)
    mu2 = gfilt(y)
    exx = gfilt(x * x)
    eyy = gfilt(y * y)
    exy = gfilt(x * y)

    mu1_sq = mu1 * mu1
    mu2_sq = mu2 * mu2
    mu12 = mu1 * mu2
    s11 = exx - mu1_sq
    s22 = eyy - mu2_sq
    s12 = exy - mu12

    # Fuse the two SSIM divides into a single reciprocal.
    # (approx=True would push this to the EUP slot but deviates ~1e-4; kept
    # exact to hold the 2e-5 tolerance against the reference.)
    num = (2.0 * mu12 + c1) * (2.0 * s12 + c2)
    den = (mu1_sq + mu2_sq + c1) * (s11 + s22 + c2)
    ssim_map = num * pl.reciprocal(den, approx=False)            # (P, HOp, WQ)

    # Mask-free padding correction: every zero-padded cell (o >= Ho or q >= Wo)
    # holds exactly the same value pad_val = (c1*c2)*recip(c1*c2) because all
    # five filtered statistics are exactly zero there.  The corner cell
    # [HOp-1, WQ-1] is padded whenever any padding exists; if no padding exists
    # the identity below is still exact.  Subtracting pad_val before the sum
    # makes padded cells contribute exactly 0.0 (no iota/compare/mask needed).
    pad_val = ssim_map[:, hop - 1:hop, wq - 1:wq]                # (P, 1, 1)
    sums = jnp.sum(ssim_map - pad_val, axis=2)                   # (P, HOp)
    plane_means = (jnp.sum(sums, axis=1, keepdims=True) * (1.0 / (ho * wo))
                   + jnp.sum(pad_val, axis=2))                   # (P, 1)
    o_ref[0] = jnp.broadcast_to(plane_means, (p, 128))


def _vmem_limit_bytes():
    """Generation-aware scoped-VMEM limit: ~70% of physical, capped at 100 MiB.

    v5e/v6e (128 MiB physical) -> ~90 MiB; v7x (64 MiB per TC) -> ~45 MiB.
    """
    phys = 64 * 1024 * 1024          # conservative fallback (v7x per-TC)
    try:
        info = pltpu.get_tpu_info()
        v = getattr(info, "vmem_capacity_bytes", None)
        if v:
            phys = int(v)
    except Exception:
        pass
    return min(int(phys * 0.7), 100 * 1024 * 1024)


def _planes_per_step(N, H, W, HOp, WQ, in_itemsize, budget_bytes):
    """Largest power-of-two P whose rough VMEM footprint fits the budget,
    capped so no dummy padding planes are processed and so the grid has at
    least 2 steps when N >= 2 (keeps both v7x TensorCores busy)."""
    per_plane = (
        2 * 2 * H * W * in_itemsize       # x, y input blocks (double-buffered), native dtype
        + 4 * (2 * H * W                  # f32 casts of x, y
               + 3 * H * W                # x*x, y*y, x*y
               + 5 * HOp * W              # stage-1 (H-filtered) maps
               + 5 * HOp * WQ             # stage-2 (fully filtered) maps
               + 8 * HOp * WQ             # elementwise epilogue temporaries (generous)
               + HOp * H)                 # per-plane share of the ah broadcast
    )
    p = 32
    while p > 1 and p * per_plane > budget_bytes:
        p //= 2
    while p > 1 and p > N:                # avoid processing dummy padding planes
        p //= 2
    while p > 1 and -(-N // p) < 2:       # keep G >= 2 so both v7x TCs get work
        p //= 2
    return p


def ssim_pallas(pred, gt, *, boundary_ignore=None, max_value=1.0):
    """Equivalent of SSIM(boundary_ignore, max_value)(pred, gt). Returns a scalar."""
    if boundary_ignore is not None:
        pred = pred[..., boundary_ignore:-boundary_ignore,
                    boundary_ignore:-boundary_ignore]
        gt = gt[..., boundary_ignore:-boundary_ignore,
                boundary_ignore:-boundary_ignore]
    assert pred.ndim == 4 and pred.shape == gt.shape
    B, C, H, W = pred.shape
    assert H >= WIN_SIZE and W >= WIN_SIZE, "spatial dims must be >= window size (11)"

    N = B * C
    Ho, Wo = H - WIN_SIZE + 1, W - WIN_SIZE + 1
    HOp = _round_up(Ho, 8)                      # sublane dim of the filtered maps
    WQ = _round_up(max(Wo, 128), 128)           # lane dim, kept a multiple of 128

    vmem_limit = _vmem_limit_bytes()
    P = _planes_per_step(N, H, W, HOp, WQ, pred.dtype.itemsize,
                         budget_bytes=vmem_limit // 2)
    G = (N + P - 1) // P
    N_pad = G * P

    # Native dtype in; cast to f32 inside the kernel.
    x = pred.reshape(N, H, W)
    y = gt.reshape(N, H, W)
    if N_pad != N:
        pad = ((0, N_pad - N), (0, 0), (0, 0))
        x = jnp.pad(x, pad)
        y = jnp.pad(y, pad)

    a_h, a_w = _conv_matrices(H, W, HOp, WQ)

    c1 = (K1 * max_value) ** 2
    c2 = (K2 * max_value) ** 2
    kernel = functools.partial(_ssim_kernel, c1=c1, c2=c2,
                               ho=Ho, wo=Wo, hop=HOp, wq=WQ, p=P)

    out = pl.pallas_call(
        kernel,
        out_shape=jax.ShapeDtypeStruct((G, P, 128), jnp.float32),
        grid_spec=pltpu.PrefetchScalarGridSpec(
            num_scalar_prefetch=0,
            grid=(G,),
            in_specs=[
                pl.BlockSpec((P, H, W), lambda g: (g, 0, 0)),
                pl.BlockSpec((P, H, W), lambda g: (g, 0, 0)),
                pl.BlockSpec((HOp, H), lambda g: (0, 0)),
                pl.BlockSpec((W, WQ), lambda g: (0, 0)),
            ],
            out_specs=pl.BlockSpec((1, P, 128), lambda g: (g, 0, 0)),
        ),
        compiler_params=pltpu.CompilerParams(
            dimension_semantics=("parallel",),
            vmem_limit_bytes=int(vmem_limit),
        ),
    )(x, y, a_h, a_w)

    per_plane = out[:, :, 0].reshape(N_pad)[:N]
    return jnp.mean(per_plane)


def _ssim_reference(pred, gt, *, max_value=1.0):
    """Pure-JAX reference (mirrors pytorch_msssim ssim with size_average=True)."""
    B, C, H, W = pred.shape
    Ho, Wo = H - WIN_SIZE + 1, W - WIN_SIZE + 1
    a_h, a_w = _conv_matrices(H, W, Ho, Wo)   # unpadded
    x = pred.reshape(B * C, H, W).astype(jnp.float32)
    y = gt.reshape(B * C, H, W).astype(jnp.float32)
    gf = lambda z: jnp.einsum("oh,bhw,wq->boq", a_h, z, a_w)
    c1 = (K1 * max_value) ** 2
    c2 = (K2 * max_value) ** 2
    mu1, mu2 = gf(x), gf(y)
    s11 = gf(x * x) - mu1 * mu1
    s22 = gf(y * y) - mu2 * mu2
    s12 = gf(x * y) - mu1 * mu2
    cs = (2 * s12 + c2) / (s11 + s22 + c2)
    sm = ((2 * mu1 * mu2 + c1) / (mu1 * mu1 + mu2 * mu2 + c1)) * cs
    return jnp.mean(sm.reshape(B * C, -1).mean(-1))


if __name__ == "__main__":
    key = jax.random.PRNGKey(0)
    k1, k2 = jax.random.split(key)
    B, C, H, W = 2, 4, 16, 16
    pred = jax.random.uniform(k1, (B, C, H, W), dtype=jnp.float32)
    gt = jnp.clip(pred + 0.05 * jax.random.normal(k2, (B, C, H, W), dtype=jnp.float32),
                  0.0, 1.0)

    result = ssim_pallas(pred, gt, boundary_ignore=None, max_value=1.0)
    result = jax.block_until_ready(result)

    ref = _ssim_reference(pred, gt, max_value=1.0)
    assert jnp.allclose(result, ref, atol=2e-5, rtol=2e-5), (result, ref)
    print("KERNEL_OK")
</pallas_src>

<mosaic_0001>
module attributes {stable_mosaic.version = 11 : i64} {
  func.func @_ssim_kernel(%arg0: i32, %arg1: memref<4x16x16xf32, #tpu.memory_space<vmem>>, %arg2: memref<4x16x16xf32, #tpu.memory_space<vmem>>, %arg3: memref<8x16xf32, #tpu.memory_space<vmem>>, %arg4: memref<16x128xf32, #tpu.memory_space<vmem>>, %arg5: memref<1x4x128xf32, #tpu.memory_space<vmem>>) attributes {dimension_semantics = [#tpu.dimension_semantics<parallel>], iteration_bounds = array<i64: 2>, scalar_prefetch = 0 : i64, scratch_operands = 0 : i64, tpu.core_type = #tpu.core_type<tc>, window_params = [{transform_indices = @transform_0, window_bounds = array<i64: 4, 16, 16>}, {transform_indices = @transform_1, window_bounds = array<i64: 4, 16, 16>}, {pipeline_mode = #tpu.pipeline_mode<synchronous>, transform_indices = @transform_2, window_bounds = array<i64: 8, 16>}, {pipeline_mode = #tpu.pipeline_mode<synchronous>, transform_indices = @transform_3, window_bounds = array<i64: 16, 128>}, {transform_indices = @transform_4, window_bounds = array<i64: 1, 4, 128>}]} {
    %c0 = arith.constant 0 : index
    %c0_0 = arith.constant 0 : index
    %c0_1 = arith.constant 0 : index
    %0 = vector.load %arg1[%c0, %c0_0, %c0_1] : memref<4x16x16xf32, #tpu.memory_space<vmem>>, vector<4x16x16xf32>
    %c0_2 = arith.constant 0 : index
    %c0_3 = arith.constant 0 : index
    %c0_4 = arith.constant 0 : index
    %1 = vector.load %arg2[%c0_2, %c0_3, %c0_4] : memref<4x16x16xf32, #tpu.memory_space<vmem>>, vector<4x16x16xf32>
    %c0_5 = arith.constant 0 : index
    %c0_6 = arith.constant 0 : index
    %2 = vector.load %arg3[%c0_5, %c0_6] : memref<8x16xf32, #tpu.memory_space<vmem>>, vector<8x16xf32>
    %c0_7 = arith.constant 0 : index
    %c0_8 = arith.constant 0 : index
    %3 = vector.load %arg4[%c0_7, %c0_8] : memref<16x128xf32, #tpu.memory_space<vmem>>, vector<16x128xf32>
    %4 = vector.shape_cast %2 : vector<8x16xf32> to vector<1x8x16xf32>
    %5 = vector.shape_cast %4 : vector<1x8x16xf32> to vector<1x8x16xf32>
    %6 = vector.broadcast %5 : vector<1x8x16xf32> to vector<4x8x16xf32>
    "tpu.trace_start"() <{level = 10 : i32, message = "poh,phw->pow"}> : () -> ()
    %cst = arith.constant dense<0.000000e+00> : vector<4x8x16xf32>
    %7 = tpu.matmul %6, %0, %cst {dimension_numbers = #tpu.dot_dimension_numbers<[2], [1], [1], [2], [0, 0, 0, 1, 1, 2], [0], [0]>} : vector<4x8x16xf32>, vector<4x16x16xf32>, vector<4x8x16xf32> -> vector<4x8x16xf32>
    "tpu.trace_stop"() : () -> ()
    %8 = vector.shape_cast %7 : vector<4x8x16xf32> to vector<32x16xf32>
    %cst_9 = arith.constant dense<0.000000e+00> : vector<32x128xf32>
    %9 = tpu.matmul %8, %3, %cst_9 {dimension_numbers = #tpu.dot_dimension_numbers<[1], [0], [0], [1], [0, 0, 1, 1], [], []>} : vector<32x16xf32>, vector<16x128xf32>, vector<32x128xf32> -> vector<32x128xf32>
    %10 = vector.shape_cast %9 : vector<32x128xf32> to vector<4x8x128xf32>
    "tpu.trace_start"() <{level = 10 : i32, message = "poh,phw->pow"}> : () -> ()
    %cst_10 = arith.constant dense<0.000000e+00> : vector<4x8x16xf32>
    %11 = tpu.matmul %6, %1, %cst_10 {dimension_numbers = #tpu.dot_dimension_numbers<[2], [1], [1], [2], [0, 0, 0, 1, 1, 2], [0], [0]>} : vector<4x8x16xf32>, vector<4x16x16xf32>, vector<4x8x16xf32> -> vector<4x8x16xf32>
    "tpu.trace_stop"() : () -> ()
    %12 = vector.shape_cast %11 : vector<4x8x16xf32> to vector<32x16xf32>
    %cst_11 = arith.constant dense<0.000000e+00> : vector<32x128xf32>
    %13 = tpu.matmul %12, %3, %cst_11 {dimension_numbers = #tpu.dot_dimension_numbers<[1], [0], [0], [1], [0, 0, 1, 1], [], []>} : vector<32x16xf32>, vector<16x128xf32>, vector<32x128xf32> -> vector<32x128xf32>
    %14 = vector.shape_cast %13 : vector<32x128xf32> to vector<4x8x128xf32>
    %15 = arith.mulf %0, %0 : vector<4x16x16xf32>
    "tpu.trace_start"() <{level = 10 : i32, message = "poh,phw->pow"}> : () -> ()
    %cst_12 = arith.constant dense<0.000000e+00> : vector<4x8x16xf32>
    %16 = tpu.matmul %6, %15, %cst_12 {dimension_numbers = #tpu.dot_dimension_numbers<[2], [1], [1], [2], [0, 0, 0, 1, 1, 2], [0], [0]>} : vector<4x8x16xf32>, vector<4x16x16xf32>, vector<4x8x16xf32> -> vector<4x8x16xf32>
    "tpu.trace_stop"() : () -> ()
    %17 = vector.shape_cast %16 : vector<4x8x16xf32> to vector<32x16xf32>
    %cst_13 = arith.constant dense<0.000000e+00> : vector<32x128xf32>
    %18 = tpu.matmul %17, %3, %cst_13 {dimension_numbers = #tpu.dot_dimension_numbers<[1], [0], [0], [1], [0, 0, 1, 1], [], []>} : vector<32x16xf32>, vector<16x128xf32>, vector<32x128xf32> -> vector<32x128xf32>
    %19 = vector.shape_cast %18 : vector<32x128xf32> to vector<4x8x128xf32>
    %20 = arith.mulf %1, %1 : vector<4x16x16xf32>
    "tpu.trace_start"() <{level = 10 : i32, message = "poh,phw->pow"}> : () -> ()
    %cst_14 = arith.constant dense<0.000000e+00> : vector<4x8x16xf32>
    %21 = tpu.matmul %6, %20, %cst_14 {dimension_numbers = #tpu.dot_dimension_numbers<[2], [1], [1], [2], [0, 0, 0, 1, 1, 2], [0], [0]>} : vector<4x8x16xf32>, vector<4x16x16xf32>, vector<4x8x16xf32> -> vector<4x8x16xf32>
    "tpu.trace_stop"() : () -> ()
    %22 = vector.shape_cast %21 : vector<4x8x16xf32> to vector<32x16xf32>
    %cst_15 = arith.constant dense<0.000000e+00> : vector<32x128xf32>
    %23 = tpu.matmul %22, %3, %cst_15 {dimension_numbers = #tpu.dot_dimension_numbers<[1], [0], [0], [1], [0, 0, 1, 1], [], []>} : vector<32x16xf32>, vector<16x128xf32>, vector<32x128xf32> -> vector<32x128xf32>
    %24 = vector.shape_cast %23 : vector<32x128xf32> to vector<4x8x128xf32>
    %25 = arith.mulf %0, %1 : vector<4x16x16xf32>
    "tpu.trace_start"() <{level = 10 : i32, message = "poh,phw->pow"}> : () -> ()
    %cst_16 = arith.constant dense<0.000000e+00> : vector<4x8x16xf32>
    %26 = tpu.matmul %6, %25, %cst_16 {dimension_numbers = #tpu.dot_dimension_numbers<[2], [1], [1], [2], [0, 0, 0, 1, 1, 2], [0], [0]>} : vector<4x8x16xf32>, vector<4x16x16xf32>, vector<4x8x16xf32> -> vector<4x8x16xf32>
    "tpu.trace_stop"() : () -> ()
    %27 = vector.shape_cast %26 : vector<4x8x16xf32> to vector<32x16xf32>
    %cst_17 = arith.constant dense<0.000000e+00> : vector<32x128xf32>
    %28 = tpu.matmul %27, %3, %cst_17 {dimension_numbers = #tpu.dot_dimension_numbers<[1], [0], [0], [1], [0, 0, 1, 1], [], []>} : vector<32x16xf32>, vector<16x128xf32>, vector<32x128xf32> -> vector<32x128xf32>
    %29 = vector.shape_cast %28 : vector<32x128xf32> to vector<4x8x128xf32>
    %30 = arith.mulf %10, %10 : vector<4x8x128xf32>
    %31 = arith.mulf %14, %14 : vector<4x8x128xf32>
    %32 = arith.mulf %10, %14 : vector<4x8x128xf32>
    %33 = arith.subf %19, %30 : vector<4x8x128xf32>
    %34 = arith.subf %24, %31 : vector<4x8x128xf32>
    %35 = arith.subf %29, %32 : vector<4x8x128xf32>
    %cst_18 = arith.constant 2.000000e+00 : f32
    %36 = vector.broadcast %cst_18 : f32 to vector<4x8x128xf32>
    %37 = arith.mulf %36, %32 : vector<4x8x128xf32>
    %cst_19 = arith.constant 9.99999974E-5 : f32
    %38 = vector.broadcast %cst_19 : f32 to vector<4x8x128xf32>
    %39 = arith.addf %37, %38 : vector<4x8x128xf32>
    %cst_20 = arith.constant 2.000000e+00 : f32
    %40 = vector.broadcast %cst_20 : f32 to vector<4x8x128xf32>
    %41 = arith.mulf %40, %35 : vector<4x8x128xf32>
    %cst_21 = arith.constant 8.99999984E-4 : f32
    %42 = vector.broadcast %cst_21 : f32 to vector<4x8x128xf32>
    %43 = arith.addf %41, %42 : vector<4x8x128xf32>
    %44 = arith.mulf %39, %43 : vector<4x8x128xf32>
    %45 = arith.addf %30, %31 : vector<4x8x128xf32>
    %cst_22 = arith.constant 9.99999974E-5 : f32
    %46 = vector.broadcast %cst_22 : f32 to vector<4x8x128xf32>
    %47 = arith.addf %45, %46 : vector<4x8x128xf32>
    %48 = arith.addf %33, %34 : vector<4x8x128xf32>
    %cst_23 = arith.constant 8.99999984E-4 : f32
    %49 = vector.broadcast %cst_23 : f32 to vector<4x8x128xf32>
    %50 = arith.addf %48, %49 : vector<4x8x128xf32>
    %51 = arith.mulf %47, %50 : vector<4x8x128xf32>
    %52 = tpu.reciprocal %51 : vector<4x8x128xf32> -> vector<4x8x128xf32>
    %53 = arith.mulf %44, %52 : vector<4x8x128xf32>
    %54 = vector.extract_strided_slice %53 {offsets = [0, 7, 127], sizes = [4, 1, 1], strides = [1, 1, 1]} : vector<4x8x128xf32> to vector<4x1x1xf32>
    %55 = vector.broadcast %54 : vector<4x1x1xf32> to vector<4x8x128xf32>
    %56 = arith.subf %53, %55 : vector<4x8x128xf32>
    %cst_24 = arith.constant dense<0.000000e+00> : vector<4x8xf32>
    %57 = vector.multi_reduction <add>, %56, %cst_24 [2] : vector<4x8x128xf32> to vector<4x8xf32>
    %cst_25 = arith.constant dense<0.000000e+00> : vector<4xf32>
    %58 = vector.multi_reduction <add>, %57, %cst_25 [1] : vector<4x8xf32> to vector<4xf32>
    %59 = vector.shape_cast %58 : vector<4xf32> to vector<4x1xf32>
    %cst_26 = arith.constant 0.027777778 : f32
    %60 = vector.broadcast %cst_26 : f32 to vector<4x1xf32>
    %61 = arith.mulf %59, %60 : vector<4x1xf32>
    %cst_27 = arith.constant dense<0.000000e+00> : vector<4x1xf32>
    %62 = vector.multi_reduction <add>, %54, %cst_27 [2] : vector<4x1x1xf32> to vector<4x1xf32>
    %63 = arith.addf %61, %62 : vector<4x1xf32>
    %64 = vector.shape_cast %63 : vector<4x1xf32> to vector<4x1xf32>
    %65 = vector.broadcast %64 : vector<4x1xf32> to vector<4x128xf32>
    %c0_28 = arith.constant 0 : index
    %c0_29 = arith.constant 0 : index
    %c0_30 = arith.constant 0 : index
    %66 = vector.load %arg5[%c0_28, %c0_29, %c0_30] : memref<1x4x128xf32, #tpu.memory_space<vmem>>, vector<1x4x128xf32>
    %67 = vector.shape_cast %66 : vector<1x4x128xf32> to vector<4x128xf32>
    %68 = vector.shape_cast %65 : vector<4x128xf32> to vector<1x4x128xf32>
    tpu.vector_store %arg5[%c0_28, %c0_29, %c0_30], %68 {strides = array<i32>} : memref<1x4x128xf32, #tpu.memory_space<vmem>>, vector<1x4x128xf32>,
    return
  }
  func.func @transform_0(%arg0: i32) -> (i32, i32, i32) {
    %c0_i32 = arith.constant 0 : i32
    %c0_i32_0 = arith.constant 0 : i32
    %c0_i32_1 = arith.constant 0 : i32
    return %arg0, %c0_i32, %c0_i32_0 : i32, i32, i32
  }
  func.func @transform_1(%arg0: i32) -> (i32, i32, i32) {
    %c0_i32 = arith.constant 0 : i32
    %c0_i32_0 = arith.constant 0 : i32
    %c0_i32_1 = arith.constant 0 : i32
    return %arg0, %c0_i32, %c0_i32_0 : i32, i32, i32
  }
  func.func @transform_2(%arg0: i32) -> (i32, i32) {
    %c0_i32 = arith.constant 0 : i32
    %c0_i32_0 = arith.constant 0 : i32
    %c0_i32_1 = arith.constant 0 : i32
    return %c0_i32, %c0_i32_0 : i32, i32
  }
  func.func @transform_3(%arg0: i32) -> (i32, i32) {
    %c0_i32 = arith.constant 0 : i32
    %c0_i32_0 = arith.constant 0 : i32
    %c0_i32_1 = arith.constant 0 : i32
    return %c0_i32, %c0_i32_0 : i32, i32
  }
  func.func @transform_4(%arg0: i32) -> (i32, i32, i32) {
    %c0_i32 = arith.constant 0 : i32
    %c0_i32_0 = arith.constant 0 : i32
    %c0_i32_1 = arith.constant 0 : i32
    return %arg0, %c0_i32, %c0_i32_0 : i32, i32, i32
  }
}

</mosaic_0001>

<bundles_post_ra>
// kernel: tpu_custom_call.1
= control target key start
LH: loop header
LB: loop body
LE: loop exit
PB: predicated region body
PF: predicated region fallthrough
CT: control target
= control target key end

     0   :  { %s2059_s0 = inlined_call_operand.hbm [shape: f32[8,16,16], index: 0, kind: input, shape index: {}]   ;;  %s2060_s1 = inlined_call_operand.hbm [shape: f32[8,16,16], index: 1, kind: input, shape index: {}]   ;;  %s2061_s2 = inlined_call_operand.hbm [shape: f32[8,16], index: 2, kind: input, shape index: {}]   ;;  %s2062_s3 = inlined_call_operand.hbm [shape: f32[16,128], index: 3, kind: input, shape index: {}]   ;;  %s2063_s4 = inlined_call_operand.hbm [shape: f32[2,4,128], index: 4, kind: output, shape index: {}]  }
   0x1   :  { %2064 = sst [smem:[#allocation17_spill]] %s2061_s2 }
   0x2   :  { %2065 = sst [smem:[#allocation18_spill]] %s2062_s3 }
   0x3   :  { %9 = vsyncpa [#allocation3], 0 }
   0x4   :  { %11 = vsyncpa [#allocation3 + $0x1], 0 }
   0x5   :  { %12 = vsyncpa [#allocation6], 0 }
   0x6   :  { %14 = vsyncpa [#allocation6 + $0x1], 0 }
   0x7   :  { %15 = vsyncpa [#allocation9], 0 }
   0x8   :  { %16 = vsyncpa [#allocation4], 0 }
   0x9   :  { %18 = vsyncpa [#allocation4 + $0x1], 0  ;;  %s1678_s15 = smov 0   ;;  %s1680_s16 = smov 0  }
   0xa   :  { %s1682_s17 = smov 0   ;;  %s1684_s18 = smov 0  }
   0xb LB: > { %s1699_s19 = sadd.s32 4294967295, %s1645_s18   ;;  %s1286_s20 = sadd.s32 4294967294, %s1645_s18   ;;  %s1645_s18 = sphi %s1684_s18, %s2080_s18   ;;  %s1641_s17 = sphi %s1682_s17, %s2079_s17   ;;  %s1637_s16 = sphi %s1680_s16, %s2078_s16   ;;  %s1633_s15 = sphi %s1678_s15, %s2077_s15  }
   0xc   : > { %s1703_s21 = sadd.s32 1, %s1645_s18   ;;  %s31_s22 = sadd.s32 1, %s1641_s17 }
   0xd   : > { %s28_s23 = ssub.s32 %s1645_s18, %s1703_s21  ;;  %p38_p0 = scmp.ne.s32.totalorder %s1641_s17, %s1637_s16 }
   0xe   : > { %p29_p1 = scmp.eq.s32.totalorder %s28_s23, 0  ;;  %p39_p2 = scmp.eq.s32.totalorder %s1645_s18, 0 }
   0xf   : > { %p44_p3 = scmp.ne.s32.totalorder %s1637_s16, %s1633_s15  ;;  %p45_p4 = scmp.eq.s32.totalorder %s1699_s19, 0 }
  0x10   : > { %s1715_s24 = scalar_select %p29_p1, %s1641_s17, %s31_s22  }
  0x11   : > { %p1717_p5 = por %p39_p2, %p38_p0  ;;  %p1723_p6 = por %p45_p4, %p44_p3 }
  0x12   : > { %2066 = sst [smem:[#allocation16_spill]] %s1715_s24  ;;  %p136_p7 = scmp.eq.s32.totalorder %s1699_s19, 1 }
  0x13   : > { %p142_p8 = scmp.eq.s32.totalorder %s1286_s20, 1  ;;  %p1287_p9 = scmp.ge.s32.totalorder %s1645_s18, 1 }
  0x14   : > { %p149_p10 = scmp.lt.s32.totalorder %s1645_s18, 3  ;;  %p1730_p11 = por %p136_p7, %p38_p0 }
  0x15   : > { %p1734_p12 = por %p142_p8, %p44_p3  ;;  %s2072_s2 = sld [smem:[#allocation17_spill]] }
  0x16   : > { %p1738_p13 = pnand %p1287_p9, %p149_p10  ;;  %s1647_s7 = smov [#allocation7]  }
  0x17   : > { %s163_s8 = sshll.u32 %s1647_s7, 4  ;;  %p1395_p3 = scmp.lt.s32.totalorder %s1645_s18, 2  ;;  %s164_s8 = int_to_ptr.vmem [resolvable:$true] %s163_s8 }
  0x18   : > { %p1375_p1 = pneg %p1738_p13  ;;  %s2073_s3 = sld [smem:[#allocation18_spill]] }
  0x19   : > { %p1756_p7 = pnand %p1395_p3, %p1717_p5  ;;  %s1648_s13 = smov [#allocation8]  }
  0x1a   : > { %p1376_p2 = pnand %p1375_p1, %p45_p4  ;;  %s174_s14 = sshll.u32 %s1648_s13, 4  ;;  %s175_s14 = int_to_ptr.vmem [resolvable:$true] %s174_s14 }
  0x1b   : > { %s161_s6 = sshll.u32 %s2072_s2, 4  ;;  %s188_s20 = sand.u32 1, %s1641_s17   ;;  %s162_s6 = int_to_ptr.hbm [resolvable:$true] %s161_s6 }
  0x1c   : > { %1378 = dma.hbm_to_vmem [thread:$0]  (!%p1376_p2), %s162_s6, 128, %s164_s8, [#allocation6]  }
  0x1d   : > { %s1649_s22 = smov 128   ;;  %s1650_s23 = smov 8  }
  0x1e   : > { %s172_s11 = sshll.u32 %s2073_s3, 4  ;;  %s1291_s30 = sshll.u32 %s188_s20, 6  ;;  %s173_s11 = int_to_ptr.hbm [resolvable:$true] %s172_s11 }
  0x1f   : > { %1381 = dma.hbm_to_vmem [thread:$0]  (!%p1376_p2), %s173_s11, 256, %s175_s14, [#allocation9], %s1649_s22, %s1649_s22, %s1650_s23  }
  0x20   : > { %s1350_s5 = sshll.u32 %s1645_s18, 6  ;;  %s192_s8 = scalar_lea.vmem [#allocation2], %s1291_s30 }
  0x21   : > { %s198_s7 = scalar_lea.hbm %s2059_s0, %s1350_s5  ;;  %s201_s9 = sshll.u32 %s192_s8, 4  ;;  %s202_s9 = int_to_ptr.vmem [resolvable:$true] %s201_s9 }
  0x22   : > { %s199_s10 = sshll.u32 %s198_s7, 4  ;;  %s189_s13 = scalar_lea.sflag [#allocation3], %s188_s20  ;;  %s200_s10 = int_to_ptr.hbm [resolvable:$true] %s199_s10 }
  0x23   : > { %s1507_s2 = sshra.s32 %s200_s10, 4  ;;  %p1511_p8 = pneg %p1756_p7  ;;  %s1508_s2 = int_to_ptr.hbm [resolvable:$true] %s1507_s2 }
  0x24   : > { %s1509_s3 = scalar_lea.hbm %s1508_s2, 64  ;;  %s1514_s6 = scalar_lea.hbm %s2059_s0, 128 }
  0x25   : > { %p1510_p5 = scmp.ne.s32.totalorder %s1508_s2, %s1509_s3  ;;  %p1515_p1 = scmp.lt.s32.totalorder %s1508_s2, %s2059_s0 }
  0x26   : > { %p1516_p2 = scmp.lt.s32.totalorder %s1514_s6, %s1509_s3 }
  0x27   : > { %p1512_p9 = pnand %p1511_p8, %p1510_p5 }
  0x28   : > { %p1517_p3 = por %p1516_p2, %p1515_p1 }
  0x29   : > { %p1513_p10 = pneg %p1512_p9 }
  0x2b   : > { %p1518_p0 = pnand %p1517_p3, %p1513_p10 }
  0x2d   : > { %1521 = shalt.err (!%p1518_p0)
}
  0x2e   : > { %1385 = dma.hbm_to_vmem [thread:$0]  (!%p1756_p7), %s200_s10, 1024, %s202_s9, %s189_s13, %s1649_s22, %s1649_s22, %s1650_s23  }
  0x2f   : > { %s221_s11 = scalar_lea.hbm %s2060_s1, %s1350_s5  ;;  %s215_s14 = scalar_lea.vmem [#allocation5], %s1291_s30 }
  0x30   : > { %s224_s24 = sshll.u32 %s215_s14, 4  ;;  %s222_s25 = sshll.u32 %s221_s11, 4  ;;  %s225_s24 = int_to_ptr.vmem [resolvable:$true] %s224_s24  ;;  %s223_s25 = int_to_ptr.hbm [resolvable:$true] %s222_s25 }
  0x31   : > { %s211_s2 = sand.u32 1, %s1645_s18   ;;  %s1537_s6 = sshra.s32 %s223_s25, 4  ;;  %s1538_s6 = int_to_ptr.hbm [resolvable:$true] %s1537_s6 }
  0x32   : > { %s212_s3 = scalar_lea.sflag [#allocation6], %s211_s2  ;;  %s1539_s8 = scalar_lea.hbm %s1538_s6, 64 }
  0x33   : > { %p1540_p0 = scmp.ne.s32.totalorder %s1538_s6, %s1539_s8  ;;  %s1544_s13 = scalar_lea.hbm %s2060_s1, 128 }
  0x34   : > { %p1545_p10 = scmp.lt.s32.totalorder %s1538_s6, %s2060_s1  ;;  %p1546_p1 = scmp.lt.s32.totalorder %s1544_s13, %s1539_s8 }
  0x35   : > { %p1542_p5 = pnand %p1540_p0, %p1511_p8 }
  0x36   : > { %p1547_p2 = por %p1546_p1, %p1545_p10 }
  0x37   : > { %p1543_p9 = pneg %p1542_p5 }
  0x39   : > { %p1548_p3 = pnand %p1547_p2, %p1543_p9 }
  0x3b   : > { %1551 = shalt.err (!%p1548_p3)
}
  0x3c   : > { %1388 = dma.hbm_to_vmem [thread:$0]  (!%p1756_p7), %s223_s25, 1024, %s225_s24, %s212_s3, %s1649_s22, %s1649_s22, %s1650_s23  }
  0x3d   : > { %236 = sbr.rel (%p1738_p13) target bundleno = 1055 (0x41f), region = 36  ;;  %s1805_s20 = sand.u32 (!%p1738_p13), 1, %s1637_s16  }
  0x3e   : > { %s1300_s7 = sshll.u32 (!%p1738_p13), %s1805_s20, 6  ;;  %s239_s11 = scalar_lea.sflag (!%p1738_p13), [#allocation3], %s1805_s20 }
  0x3f   : > { %s1809_s14 = scalar_lea.vmem (!%p1738_p13), [#allocation2], %s1300_s7 }
  0x42   : > { %1612 = dma.done.wait (%p1723_p6), %s239_s11, 1024  }
  0x43   : > { %1614 = vsyncadd (%p1723_p6), %s239_s11, 4294966272  ;;  %s248_s24 = sand.u32 1, %s1699_s19   ;;  %s1816_s12 = scalar_lea.vmem [#allocation5], %s1300_s7 }
  0x44   : > { %s249_s29 = scalar_lea.sflag [#allocation6], %s248_s24 }
  0x45   : > { %1616 = dma.done.wait (%p1723_p6), %s249_s29, 1024  }
  0x46   : > { %1618 = vsyncadd (%p1723_p6), %s249_s29, 4294966272 }
  0x47   : > { %1620 = dma.done.wait (%p45_p4), [#allocation6], 128  }
  0x48   : > { %1622 = vsyncadd (%p45_p4), [#allocation6], 4294967168 }
  0x49   : > { %1624 = dma.done.wait (%p45_p4), [#allocation9], 256  }
  0x4a   : > { %1626 = vsyncadd (%p45_p4), [#allocation9], 4294967040  ;;  %v296_v0 = vld [vmem:[%s1809_s14 + $0x8] sm:$0xff]  ;;  %v298_v1 = vld [vmem:[%s1809_s14 + $0x18] sm:$0xff]  ;;  %vm314_vm0 = vcmask 130048   ;;  %s1651_s26 = smov 1  }
  0x4b   : > { %v1833_v2 = vld [vmem:[%s1809_s14] sm:$0xff]  ;;  %332 = vmatpush.msra.mxu0 %v296_v0  ;;  %352 = vmatpush.msra.mxu1 %v298_v1  ;;  %v1836_v3 = vld [vmem:[%s1809_s14 + $0x10] sm:$0xff]  ;;  %v300_v4 = vld [vmem:[%s1809_s14 + $0x28] sm:$0xff]  ;;  %v561_v5 = vmul.f32 %v296_v0, %v296_v0  ;;  %v563_v28 = vmul.f32 %v298_v1, %v298_v1  ;;  %s1304_s3 = sshll.u32 %s1805_s20, 2  ;;  %s1346_s6 = sshll.u32 %s1699_s19, 2 }
  0x4c   : > { %v1839_v6 = vld [vmem:[#allocation7] sm:$0xff]  ;;  %372 = vmatpush.msra.mxu2 %v300_v4  ;;  %v560_v8 = vmul.f32 %v1833_v2, %v1833_v2  ;;  %v304_v9 = vld [vmem:[%s1816_s12 + $0x8] sm:$0xff]  ;;  %v306_v11 = vld [vmem:[%s1816_s12 + $0x18] sm:$0xff]  ;;  %v565_v17 = vmul.f32 %v300_v4, %v300_v4  ;;  %v562_v29 = vmul.f32 %v1836_v3, %v1836_v3  ;;  %s1169_s10 = scalar_lea.hbm %s2063_s4, %s1346_s6  ;;  %s292_s13 = scalar_lea.vmem [#allocation10], %s1304_s3 }
  0x4d   : > { %v1842_v7 = vld [vmem:[%s1809_s14 + $0x20] sm:$0xff]  ;;  %333 = vmatpush.msra.mxu0 %v1833_v2  ;;  %353 = vmatpush.msra.mxu1 %v1836_v3  ;;  %v1849_v10 = vmul.f32 %v304_v9, %v296_v0  ;;  %v1854_v12 = vmul.f32 %v306_v11, %v298_v1  ;;  %v308_v13 = vld [vmem:[%s1816_s12 + $0x28] sm:$0xff]  ;;  %v302_v15 = vld [vmem:[%s1809_s14 + $0x38] sm:$0xff]  ;;  %v690_v26 = vmul.f32 %v304_v9, %v304_v9  ;;  %s1171_s5 = sshll.u32 %s292_s13, 4  ;;  %s1173_s30 = sshll.u32 %s1169_s10, 4  ;;  %s1172_s5 = int_to_ptr.vmem [resolvable:$true] %s1171_s5  ;;  %s1174_s30 = int_to_ptr.hbm [resolvable:$true] %s1173_s30 }
  0x4e   : > { %582 = vmatpush.msra.mxu3 %v561_v5  ;;  %1305 = vmatmul.msk.f32.vlgmr.msra.gmra.mxu0 %vm314_vm0, %v1839_v6  ;;  %v1860_v14 = vmul.f32 %v308_v13, %v300_v4  ;;  %v310_v16 = vld [vmem:[%s1816_s12 + $0x38] sm:$0xff]  ;;  %v1867_v18 = vld [vmem:[%s1816_s12] sm:$0xff]  ;;  %v1874_v20 = vld [vmem:[%s1816_s12 + $0x10] sm:$0xff]  ;;  %v564_v21 = vmul.f32 %v1842_v7, %v1842_v7  ;;  %v567_v30 = vmul.f32 %v302_v15, %v302_v15  ;;  %s1159_s7 = scalar_lea.sflag [#allocation4], %s1805_s20  ;;  %s1581_s11 = sshra.s32 %s1174_s30, 4  ;;  %s1582_s11 = int_to_ptr.hbm [resolvable:$true] %s1581_s11 }
  0x4f   : > { %1306 = vmatmul.msk.f32.vlgmr.msra.gmra.mxu1 %vm314_vm0, %v1839_v6  ;;  %373 = vmatpush.msra.mxu2 %v1842_v7  ;;  %v1869_v19 = vmul.f32 %v310_v16, %v302_v15  ;;  %v1879_v22 = vld [vmem:[%s1809_s14 + $0x30] sm:$0xff]  ;;  %v1883_v23 = vld [vmem:[%s1816_s12 + $0x20] sm:$0xff]  ;;  %v312_v27 = vld [vmem:[#allocation8] sm:$0xff]  ;;  %v692_v32 = vmul.f32 %v306_v11, %v306_v11  ;;  %v689_v33 = vmul.f32 %v1867_v18, %v1867_v18  ;;  %s1583_s14 = scalar_lea.hbm %s1582_s11, 4  ;;  %s1587_s29 = scalar_lea.hbm %s2063_s4, 8 }
  0x50   : > { %583 = vmatpush.msra.mxu3 %v560_v8  ;;  %1307 = vmatmul.msk.f32.vlgmr.msra.gmra.mxu2 %vm314_vm0, %v1839_v6  ;;  %v1893_v24 = vld [vmem:[%s1816_s12 + $0x30] sm:$0xff]  ;;  %v566_v31 = vmul.f32 %v1879_v22, %v1879_v22  ;;  %v694_v34 = vmul.f32 %v308_v13, %v308_v13  ;;  %v696_v37 = vmul.f32 %v310_v16, %v310_v16  ;;  %p1584_p4 = scmp.ne.s32.totalorder %s1582_s11, %s1583_s14  ;;  %p1588_p7 = scmp.lt.s32.totalorder %s1582_s11, %s2063_s4 }
  0x51   : > { %1321 = vmatmul.msk.f32.vlgmr.msra.gmra.mxu3 %vm314_vm0, %v1839_v6  ;;  %453 = vmatpush.msrb.mxu1 %v304_v9  ;;  %v313_v25 = vld [vmem:[#allocation8 + $0x8] sm:$0xff]  ;;  %v691_v38 = vmul.f32 %v1874_v20, %v1874_v20  ;;  %v693_v39 = vmul.f32 %v1883_v23, %v1883_v23  ;;  %v695_v43 = vmul.f32 %v1893_v24, %v1893_v24  ;;  %p1589_p8 = scmp.lt.s32.totalorder %s1587_s29, %s1583_s14 }
  0x52   : > { %473 = vmatpush.msrb.mxu2 %v306_v11  ;;  %392 = vmatpush.msrb.mxu0 %v302_v15  ;;  %v820_v46 = vmul.f32 %v1874_v20, %v1836_v3  ;;  %v824_v49 = vmul.f32 %v1893_v24, %v1879_v22  ;;  %v818_v51 = vmul.f32 %v1867_v18, %v1833_v2  ;;  %p1585_p6 = pnand %p1584_p4, %p1730_p11 }
  0x53   : > { %454 = vmatpush.msrb.mxu1 %v1867_v18  ;;  %622 = vmatpush.msrb.mxu3 %v565_v17  ;;  %v822_v53 = vmul.f32 %v1883_v23, %v1842_v7  ;;  %p1590_p0 = por %p1589_p8, %p1588_p7 }
  0x54   : > { %474 = vmatpush.msrb.mxu2 %v1874_v20  ;;  %393 = vmatpush.msrb.mxu0 %v1879_v22  ;;  %p1586_p13 = pneg %p1585_p6 }
  0x55   : > { %493 = vmatpush.msra.mxu1 %v308_v13  ;;  %623 = vmatpush.msrb.mxu3 %v564_v21 }
  0x56   : > { %1308 = vmatmul.msk.f32.vlgmr.msrb.gmra.mxu0 %vm314_vm0, %v1839_v6  ;;  %545 = vmatpush.msra.mxu2 %v313_v25  ;;  %p1591_p5 = pnand %p1590_p0, %p1586_p13 }
  0x57   : > { %494 = vmatpush.msra.mxu1 %v1883_v23  ;;  %424 = vmatpush.msra.mxu0 %v313_v25 }
  0x58   : > { %1313 = vmatmul.msk.f32.vlgmr.msrb.gmra.mxu1 %vm314_vm0, %v1839_v6  ;;  %1314 = vmatmul.msk.f32.vlgmr.msrb.gmra.mxu2 %vm314_vm0, %v1839_v6 }
  0x59   : > { %513 = vmatpush.msrb.mxu1 %v310_v16  ;;  %1323 = vmatmul.msk.f32.vlgmr.msrb.gmra.mxu3 %vm314_vm0, %v1839_v6 }
  0x5a   : > { %425 = vmatpush.msra.mxu0 %v312_v27  ;;  %674 = vmatpush.msra.mxu3 %v313_v25 }
  0x5b   : > { %514 = vmatpush.msrb.mxu1 %v1893_v24  ;;  %546 = vmatpush.msra.mxu2 %v312_v27 }
  0x5c   : > { %711 = vmatpush.msrb.mxu0 %v690_v26  ;;  %675 = vmatpush.msra.mxu3 %v312_v27 }
  0x5d   : > { %803 = vmatpush.msrb.mxu2 %v313_v25 }
  0x5e   : > { %932 = vmatpush.msrb.mxu3 %v313_v25  ;;  %712 = vmatpush.msrb.mxu0 %v689_v33 }
  0x5f   : > { %804 = vmatpush.msrb.mxu2 %v312_v27 }
  0x60   : > { %1315 = vmatmul.msk.f32.vlgmr.msra.gmra.mxu1 %vm314_vm0, %v1839_v6  ;;  %933 = vmatpush.msrb.mxu3 %v312_v27 }
  0x61   : > { %602 = vmatpush.msra.mxu1 %v563_v28 }
  0x63   : > { %603 = vmatpush.msra.mxu1 %v562_v29 }
  0x68   : > { %1316 = vmatmul.msk.f32.vlgmr.msrb.gmra.mxu1 %vm314_vm0, %v1839_v6 }
  0x69   : > { %642 = vmatpush.msrb.mxu1 %v567_v30 }
  0x6b   : > { %643 = vmatpush.msrb.mxu1 %v566_v31 }
  0x70   : > { %1322 = vmatmul.msk.f32.vlgmr.msra.gmra.mxu1 %vm314_vm0, %v1839_v6 }
  0x71   : > { %731 = vmatpush.msra.mxu1 %v692_v32 }
  0x73   : > { %732 = vmatpush.msra.mxu1 %v691_v38 }
  0x78   : > { %1324 = vmatmul.msk.f32.vlgmr.msrb.gmra.mxu1 %vm314_vm0, %v1839_v6 }
  0x79   : > { %771 = vmatpush.msrb.mxu1 %v696_v37 }
  0x7b   : > { %772 = vmatpush.msrb.mxu1 %v695_v43 }
  0x80   : > { %1330 = vmatmul.msk.f32.vlgmr.msra.gmra.mxu1 %vm314_vm0, %v1839_v6 }
  0x81   : > { %860 = vmatpush.msra.mxu1 %v1854_v12 }
  0x83   : > { %861 = vmatpush.msra.mxu1 %v820_v46 }
  0x88   : > { %1332 = vmatmul.msk.f32.vlgmr.msrb.gmra.mxu1 %vm314_vm0, %v1839_v6 }
  0x89   : > { %900 = vmatpush.msrb.mxu1 %v1869_v19 }
  0x8b   : > { %901 = vmatpush.msrb.mxu1 %v824_v49 }
  0x90   : > { %1338 = vmatmul.msk.f32.vlgmr.msra.gmra.mxu1 %vm314_vm0, %v1839_v6 }
  0x98   : > { %1340 = vmatmul.msk.f32.vlgmr.msrb.gmra.mxu1 %vm314_vm0, %v1839_v6 }
  0xcb   : > { %v335_v35 = vpop.f32.mrf.mxu0 }
  0xcc   : > { %v355_v36 = vpop.f32.mrf.mxu1  ;;  %1309 = vmatmul.msk.f32.vlgmr.msra.gmra.mxu0 %vm314_vm0, %v335_v35 }
  0xcd   : > { %751 = vmatpush.msra.mxu0 %v694_v34 }
  0xcf   : > { %752 = vmatpush.msra.mxu0 %v693_v39 }
  0xd3   : > { %v375_v40 = vpop.f32.mrf.mxu2  ;;  %v395_v47 = vpop.f32.mrf.mxu0 }
  0xd4   : > { %v585_v42 = vpop.f32.mrf.mxu3  ;;  %1310 = vmatmul.msk.f32.gmra.mxu0 %vm314_vm0, %v355_v36 }
  0xd5   : > { %v456_v41 = vpop.f32.mrf.mxu1  ;;  %1325 = vmatmul.msk.f32.vlgmr.msra.gmra.mxu3 %vm314_vm0, %v585_v42 }
  0xd6   : > { %1317 = vmatmul.msk.f32.vlgmr.msra.gmra.mxu2 %vm314_vm0, %v456_v41 }
  0xdb   : > { %v476_v44 = vpop.f32.mrf.mxu2 }
  0xdc   : > { %1311 = vmatmul.msk.f32.gmra.mxu0 %vm314_vm0, %v375_v40  ;;  %v625_v52 = vpop.f32.mrf.mxu3 }
  0xdd   : > { %v496_v45 = vpop.f32.mrf.mxu1 }
  0xde   : > { %1318 = vmatmul.msk.f32.gmra.mxu2 %vm314_vm0, %v476_v44 }
  0xe4   : > { %1312 = vmatmul.msk.f32.gmra.mxu0 %vm314_vm0, %v395_v47 }
  0xe5   : > { %v516_v48 = vpop.f32.mrf.mxu1 }
  0xe6   : > { %1319 = vmatmul.msk.f32.gmra.mxu2 %vm314_vm0, %v496_v45 }
  0xec   : > { %1329 = vmatmul.msk.f32.vlgmr.msrb.gmra.mxu0 %vm314_vm0, %v1839_v6 }
  0xed   : > { %v605_v50 = vpop.f32.mrf.mxu1  ;;  %840 = vmatpush.msrb.mxu0 %v1849_v10 }
  0xee   : > { %1320 = vmatmul.msk.f32.gmra.mxu2 %vm314_vm0, %v516_v48  ;;  %1326 = vmatmul.msk.f32.gmra.mxu3 %vm314_vm0, %v605_v50 }
  0xef   : > { %841 = vmatpush.msrb.mxu0 %v818_v51 }
  0xf4   : > { %1331 = vmatmul.msk.f32.vlgmr.msra.gmra.mxu0 %vm314_vm0, %v1839_v6 }
  0xf5   : > { %880 = vmatpush.msra.mxu0 %v1860_v14  ;;  %v645_v54 = vpop.f32.mrf.mxu1 }
  0xf6   : > { %1327 = vmatmul.msk.f32.gmra.mxu3 %vm314_vm0, %v625_v52 }
  0xf7   : > { %881 = vmatpush.msra.mxu0 %v822_v53 }
  0xfc   : > { %1337 = vmatmul.msk.f32.vlgmr.msrb.gmra.mxu0 %vm314_vm0, %v1839_v6 }
  0xfd   : > { %v734_v60 = vpop.f32.mrf.mxu1 }
  0xfe   : > { %1328 = vmatmul.msk.f32.gmra.mxu3 %vm314_vm0, %v645_v54 }
 0x104   : > { %1339 = vmatmul.msk.f32.vlgmr.msra.gmra.mxu0 %vm314_vm0, %v1839_v6 }
 0x105   : > { %v774_v62 = vpop.f32.mrf.mxu1 }
 0x10d   : > { %v863_v0 = vpop.f32.mrf.mxu1 }
 0x115   : > { %v903_v2 = vpop.f32.mrf.mxu1 }
 0x149   : > { %v427_v55 = vpop.f32.mrf.mxu0 }
 0x14a   : > { %v947_v11 = vmul.f32 %v427_v55, %v427_v55 }
 0x151   : > { %v430_v56 = vpop.f32.mrf.mxu0 }
 0x152   : > { %v948_v20 = vmul.f32 %v430_v56, %v430_v56 }
 0x158   : > { %v677_v5 = vpop.f32.mrf.mxu3 }
 0x159   : > { %v1960_v57 = vpop.f32.mrf.mxu0  ;;  %v548_v3 = vpop.f32.mrf.mxu2  ;;  %v959_v14 = vsub.f32 %v677_v5, %v947_v11 }
 0x15a   : > { %v951_v9 = vmul.f32 %v548_v3, %v548_v3  ;;  %v955_v28 = vmul.f32 %v548_v3, %v427_v55  ;;  %v949_v32 = vmul.f32 %v1960_v57, %v1960_v57 }
 0x15c   : > { %v991_v13 = vadd.f32 %v951_v9, %v947_v11  ;;  %v971_v35 = vmul.f32 2.0, %v955_v28 }
 0x15e   : > { %v995_v17 = vadd.f32 0.0001, %v991_v13  ;;  %v975_v49 = vadd.f32 0.0001, %v971_v35 }
 0x161   : > { %v1962_v58 = vpop.f32.mrf.mxu0  ;;  %v551_v4 = vpop.f32.mrf.mxu2 }
 0x162   : > { %v952_v18 = vmul.f32 %v551_v4, %v551_v4  ;;  %v956_v43 = vmul.f32 %v551_v4, %v430_v56  ;;  %v950_v52 = vmul.f32 %v1962_v58, %v1962_v58 }
 0x164   : > { %v992_v24 = vadd.f32 %v952_v18, %v948_v20 }
 0x166   : > { %v996_v30 = vadd.f32 0.0001, %v992_v24 }
 0x169   : > { %v714_v59 = vpop.f32.mrf.mxu0  ;;  %v1972_v6 = vpop.f32.mrf.mxu2 }
 0x16a   : > { %1333 = vmatmul.msk.f32.vlgmr.msrb.gmra.mxu2 %vm314_vm0, %v714_v59  ;;  %v953_v29 = vmul.f32 %v1972_v6, %v1972_v6  ;;  %v972_v59 = vmul.f32 2.0, %v956_v43 }
 0x16c   : > { %v993_v36 = vadd.f32 %v953_v29, %v949_v32  ;;  %v976_v13 = vadd.f32 0.0001, %v972_v59 }
 0x16e   : > { %v997_v53 = vadd.f32 0.0001, %v993_v36 }
 0x171   : > { %v754_v61 = vpop.f32.mrf.mxu0  ;;  %v680_v7 = vpop.f32.mrf.mxu3 }
 0x172   : > { %1334 = vmatmul.msk.f32.gmra.mxu2 %vm314_vm0, %v734_v60  ;;  %v1974_v8 = vpop.f32.mrf.mxu2  ;;  %v960_v25 = vsub.f32 %v680_v7, %v948_v20  ;;  %v957_v20 = vmul.f32 %v1972_v6, %v1960_v57 }
 0x173   : > { %v954_v45 = vmul.f32 %v1974_v8, %v1974_v8 }
 0x174   : > { %v973_v6 = vmul.f32 2.0, %v957_v20 }
 0x179   : > { %v843_v63 = vpop.f32.mrf.mxu0  ;;  %v683_v10 = vpop.f32.mrf.mxu3 }
 0x17a   : > { %1335 = vmatmul.msk.f32.gmra.mxu2 %vm314_vm0, %v754_v61  ;;  %1341 = vmatmul.msk.f32.vlgmr.msrb.gmra.mxu3 %vm314_vm0, %v843_v63  ;;  %v961_v40 = vsub.f32 %v683_v10, %v949_v32  ;;  %v994_v61 = vadd.f32 %v954_v45, %v950_v52 }
 0x181   : > { %v883_v1 = vpop.f32.mrf.mxu0  ;;  %v686_v22 = vpop.f32.mrf.mxu3 }
 0x182   : > { %1336 = vmatmul.msk.f32.gmra.mxu2 %vm314_vm0, %v774_v62  ;;  %1342 = vmatmul.msk.f32.gmra.mxu3 %vm314_vm0, %v863_v0 }
 0x18a   : > { %1343 = vmatmul.msk.f32.gmra.mxu3 %vm314_vm0, %v883_v1  ;;  %v962_v1 = vsub.f32 %v686_v22, %v950_v52 }
 0x192   : > { %1344 = vmatmul.msk.f32.gmra.mxu3 %vm314_vm0, %v903_v2 }
 0x1ed   : > { %v806_v12 = vpop.f32.mrf.mxu2 }
 0x1ee   : > { %v963_v15 = vsub.f32 %v806_v12, %v951_v9 }
 0x1f0   : > { %v999_v16 = vadd.f32 %v963_v15, %v959_v14 }
 0x1f2   : > { %v1003_v19 = vadd.f32 0.0009, %v999_v16 }
 0x1f4   : > { %v1007_v21 = vmul.f32 %v1003_v19, %v995_v17 }
 0x1f5   : > { %v809_v23 = vpop.f32.mrf.mxu2 }
 0x1f6   : > { %1439 = vrcp.f32 %v1007_v21  ;;  %v964_v26 = vsub.f32 %v809_v23, %v952_v18  ;;  %v1022_v48 = vand.u32 2147483648, %v1007_v21  ;;  %v1020_v51 = vand.u32 2147483647, %v1007_v21 }
 0x1f7   : > { %vm1016_vm2 = vweird.f32 %v1007_v21 }
 0x1f8   : > { %v1000_v27 = vadd.f32 %v964_v26, %v960_v25  ;;  %v1023_v0 = vor.u32 1.1754944e-38, %v1022_v48  ;;  %vm1021_vm4 = vcmp.eq.f32.partialorder %v1020_v51, 8.507059e+37 }
 0x1fa   : > { %v1004_v31 = vadd.f32 0.0009, %v1000_v27 }
 0x1fc   : > { %v1440_v33 = vpop.eup %1439  ;;  %v1980_v34 = vmul.f32 %v1004_v31, %v996_v30 }
 0x1fd   : > { %v812_v37 = vpop.f32.mrf.mxu2  ;;  %v935_v38 = vpop.f32.mrf.mxu3  ;;  %v1012_v39 = vmul.f32 %v1440_v33, %v1007_v21  ;;  %vm1017_vm1 = vweird.f32 %v1440_v33  ;;  %v998_v21 = vadd.f32 0.0001, %v994_v61 }
 0x1fe   : > { %1441 = vrcp.f32 %v1980_v34  ;;  %v965_v41 = vsub.f32 %v812_v37, %v953_v29  ;;  %v967_v42 = vsub.f32 %v935_v38, %v955_v28  ;;  %vm1018_vm3 = vmor %vm1016_vm2, %vm1017_vm1  ;;  %v1036_v16 = vand.u32 2147483648, %v1980_v34 }
 0x1ff   : > { %v1013_v44 = vsub.f32 1.0, %v1012_v39  ;;  %v1034_v18 = vand.u32 2147483647, %v1980_v34  ;;  %vm1030_vm6 = vweird.f32 %v1980_v34  ;;  %vm1121_vm1 = vcmask 1041409  }
 0x200   : > { %v1001_v46 = vadd.f32 %v965_v41, %v961_v40  ;;  %v979_v47 = vmul.f32 2.0, %v967_v42  ;;  %v1037_v28 = vor.u32 1.1754944e-38, %v1036_v16  ;;  %v977_v40 = vadd.f32 0.0001, %v973_v6 }
 0x201   : > { %v1014_v50 = vmul.f32 %v1440_v33, %v1013_v44  ;;  %vm1035_vm8 = vcmp.eq.f32.partialorder %v1034_v18, 8.507059e+37  ;;  %v958_v41 = vmul.f32 %v1974_v8, %v1962_v58  ;;  %vm1123_vm2 = vcmask 1042434  }
 0x202   : > { %v1005_v54 = vadd.f32 0.0009, %v1001_v46  ;;  %v983_v55 = vadd.f32 0.0009, %v979_v47 }
 0x203   : > { %v1015_v60 = vadd.f32 %v1440_v33, %v1014_v50  ;;  %v974_v50 = vmul.f32 2.0, %v958_v41 }
 0x204   : > { %v1442_v56 = vpop.eup %1441  ;;  %v1987_v62 = vmul.f32 %v1005_v54, %v997_v53  ;;  %v987_v63 = vmul.f32 %v983_v55, %v975_v49 }
 0x205   : > { %v1026_v2 = vmul.f32 %v1442_v56, %v1980_v34  ;;  %v815_v3 = vpop.f32.mrf.mxu2  ;;  %v938_v4 = vpop.f32.mrf.mxu3  ;;  %v1019_v5 = vsel %vm1018_vm3, %v1440_v33, %v1015_v60  ;;  %vm1031_vm5 = vweird.f32 %v1442_v56  ;;  %vm1128_vm3 = vcmask 60416  }
 0x206   : > { %1443 = vrcp.f32 %v1987_v62  ;;  %v966_v7 = vsub.f32 %v815_v3, %v954_v45  ;;  %v968_v9 = vsub.f32 %v938_v4, %v956_v43  ;;  %v1024_v10 = vsel %vm1021_vm4, %v1023_v0, %v1019_v5  ;;  %vm1032_vm7 = vmor %vm1030_vm6, %vm1031_vm5 }
 0x207   : > { %v1027_v11 = vsub.f32 1.0, %v1026_v2  ;;  %v1991_v12 = vmul.f32 %v1024_v10, %v987_v63  ;;  %v1050_v36 = vand.u32 2147483648, %v1987_v62  ;;  %v1048_v38 = vand.u32 2147483647, %v1987_v62 }
 0x208   : > { %v1002_v14 = vadd.f32 %v966_v7, %v962_v1  ;;  %v980_v15 = vmul.f32 2.0, %v968_v9  ;;  %vm1044_vm10 = vweird.f32 %v1987_v62  ;;  %vm1125_vm4 = vcmask 1043459  }
 0x209   : > { %v1028_v17 = vmul.f32 %v1442_v56, %v1027_v11  ;;  %v1075_v19 = vrot.slane %v1991_v12, 7  ;;  %v1051_v46 = vor.u32 1.1754944e-38, %v1050_v36  ;;  %vm1049_vm12 = vcmp.eq.f32.partialorder %v1048_v38, 8.507059e+37 }
 0x20a   : > { %v1006_v22 = vadd.f32 0.0009, %v1002_v14  ;;  %v984_v23 = vadd.f32 0.0009, %v980_v15 }
 0x20b   : > { %v1029_v24 = vadd.f32 %v1442_v56, %v1028_v17  ;;  %1079 = vrot.lane.b32.xlu0 %v1075_v19, %s1651_s26 }
 0x20c   : > { %v1444_v25 = vpop.eup %1443  ;;  %v1010_v26 = vmul.f32 %v1006_v22, %v998_v21  ;;  %v988_v27 = vmul.f32 %v984_v23, %v976_v13  ;;  %v1115_v22 = vlaneseq }
 0x20d   : > { %v1040_v29 = vmul.f32 %v1444_v25, %v1987_v62  ;;  %v1033_v30 = vsel %vm1032_vm7, %v1442_v56, %v1029_v24  ;;  %v941_v57 = vpop.f32.mrf.mxu3  ;;  %vm1045_vm9 = vweird.f32 %v1444_v25  ;;  %v978_v56 = vadd.f32 0.0001, %v974_v50 }
 0x20e   : > { %1445 = vrcp.f32 %v1010_v26  ;;  %v1038_v31 = vsel %vm1035_vm8, %v1037_v28, %v1033_v30  ;;  %v969_v32 = vsub.f32 %v941_v57, %v957_v20  ;;  %vm1046_vm11 = vmor %vm1044_vm10, %vm1045_vm9  ;;  %v1064_v54 = vand.u32 2147483648, %v1010_v26 }
 0x20f   : > { %v2003_v33 = vmul.f32 %v1038_v31, %v988_v27  ;;  %v1041_v34 = vsub.f32 1.0, %v1040_v29  ;;  %v1062_v59 = vand.u32 2147483647, %v1010_v26  ;;  %vm1058_vm14 = vweird.f32 %v1010_v26 }
 0x210   : > { %v981_v35 = vmul.f32 2.0, %v969_v32  ;;  %v1065_v0 = vor.u32 1.1754944e-38, %v1064_v54  ;;  %v1116_v24 = vand.u32 127, %v1115_v22 }
 0x211   : > { %v1042_v37 = vmul.f32 %v1444_v25, %v1041_v34  ;;  %v1076_v39 = vrot.slane %v2003_v33, 7  ;;  %vm1063_vm0 = vcmp.eq.f32.partialorder %v1062_v59, 8.507059e+37  ;;  %v1142_v34 = vrot.slane %v2003_v33, 6 }
 0x212   : > { %v985_v42 = vadd.f32 0.0009, %v981_v35 }
 0x213   : > { %v1043_v43 = vadd.f32 %v1444_v25, %v1042_v37  ;;  %1081 = vrot.lane.b32.xlu0 %v1076_v39, %s1651_s26  ;;  %v1143_v37 = vsel %vm1121_vm1, %v1142_v34, %v1075_v19 }
 0x214   : > { %v1446_v44 = vpop.eup %1445  ;;  %v989_v45 = vmul.f32 %v985_v42, %v977_v40  ;;  %v1652_v40 = vmov 0  }
 0x215   : > { %v1054_v47 = vmul.f32 %v1446_v44, %v1010_v26  ;;  %v1047_v48 = vsel %vm1046_vm11, %v1444_v25, %v1043_v43  ;;  %v944_v49 = vpop.f32.mrf.mxu3  ;;  %vm1059_vm13 = vweird.f32 %v1446_v44  ;;  %1437 = vset.pattern.permute.xlu2 %v1652_v40  ;;  %1438 = vset.pattern.permute.xlu0 %v1652_v40 }
 0x216   : > { %v1052_v51 = vsel %vm1049_vm12, %v1051_v46, %v1047_v48  ;;  %v970_v52 = vsub.f32 %v944_v49, %v958_v41  ;;  %vm1060_vm15 = vmor %vm1058_vm14, %vm1059_vm13 }
 0x217   : > { %v2012_v53 = vmul.f32 %v1052_v51, %v989_v45  ;;  %v1055_v58 = vsub.f32 1.0, %v1054_v47 }
 0x218   : > { %v982_v8 = vmul.f32 2.0, %v970_v52 }
 0x219   : > { %v1056_v55 = vmul.f32 %v1446_v44, %v1055_v58  ;;  %v1077_v60 = vrot.slane %v2012_v53, 7  ;;  %v1144_v35 = vrot.slane %v2012_v53, 5 }
 0x21a   : > { %v986_v61 = vadd.f32 0.0009, %v982_v8 }
 0x21b   : > { %v1057_v62 = vadd.f32 %v1446_v44, %v1056_v55  ;;  %1083 = vrot.lane.b32.xlu1 %v1077_v60, %s1651_s26  ;;  %v1145_v38 = vsel %vm1123_vm2, %v1144_v35, %v1143_v37 }
 0x21c   : > { %v990_v63 = vmul.f32 %v986_v61, %v978_v56 }
 0x21d   : > { %v1061_v1 = vsel %vm1060_vm15, %v1446_v44, %v1057_v62 }
 0x21e   : > { %v1066_v2 = vsel %vm1063_vm0, %v1065_v0, %v1061_v1 }
 0x21f   : > { %v1070_v3 = vmul.f32 %v1066_v2, %v990_v63 }
 0x221   : > { %v1078_v4 = vrot.slane %v1070_v3, 7  ;;  %v1146_v36 = vrot.slane %v1070_v3, 4 }
 0x223   : > { %1085 = vrot.lane.b32.xlu1 %v1078_v4, %s1651_s26  ;;  %v1147_v39 = vsel %vm1125_vm4, %v1146_v36, %v1145_v38 }
 0x27d   : > { %v1080_v5 = vpop.permute.xlu0 %1079 }
 0x27e   : > { %1353 = vpush %v1080_v5 }
 0x285   : > { %v1082_v7 = vpop.permute.xlu0 %1081 }
 0x286   : > { %1355 = vpush %v1082_v7 }
 0x28d   : > { %v1084_v9 = vpop.permute.xlu1 %1083 }
 0x28e   : > { %1357 = vpush %v1084_v9 }
 0x295   : > { %v1086_v10 = vpop.permute.xlu1 %1085 }
 0x296   : > { %1359 = vpush %v1086_v10 }
 0x2af   : > { %s1354_s22 = spop %1353 }
 0x2b0   : > { %v1088_v11 = vstv %s1354_s22 }
 0x2b1   : > { %v1099_v13 = vsub.f32 %v1991_v12, %v1088_v11 }
 0x2b3   : > { %1103 = vadd.xlane.f32.xlu2 %v1099_v13 }
 0x2b7   : > { %s1356_s23 = spop %1355 }
 0x2b8   : > { %v1091_v14 = vstv %s1356_s23 }
 0x2b9   : > { %v1100_v15 = vsub.f32 %v2003_v33, %v1091_v14 }
 0x2bb   : > { %1105 = vadd.xlane.f32.xlu2 %v1100_v15 }
 0x2bf   : > { %s1358_s25 = spop %1357 }
 0x2c0   : > { %v1094_v16 = vstv %s1358_s25 }
 0x2c1   : > { %v1101_v17 = vsub.f32 %v2012_v53, %v1094_v16 }
 0x2c3   : > { %1107 = vadd.xlane.f32.xlu0 %v1101_v17 }
 0x2c7   : > { %s1360_s2 = spop %1359 }
 0x2c8   : > { %v1097_v18 = vstv %s1360_s2 }
 0x2c9   : > { %v1102_v20 = vsub.f32 %v1070_v3, %v1097_v18 }
 0x2cb   : > { %1109 = vadd.xlane.f32.xlu1 %v1102_v20 }
 0x326   : > { %v1104_v21 = vpop.xlane.xlu2 %1103 }
 0x327   : > { %v1117_v28 = vperm.slane %v1104_v21, %v1116_v24 }
 0x32e   : > { %v1106_v23 = vpop.xlane.xlu2 %1105 }
 0x32f   : > { %v1118_v26 = vperm.slane %v1106_v23, %v1116_v24 }
 0x331   : > { %v1122_v30 = vsel %vm1121_vm1, %v1118_v26, %v1117_v28 }
 0x336   : > { %v1108_v25 = vpop.xlane.xlu0 %1107 }
 0x337   : > { %v1119_v27 = vperm.slane %v1108_v25, %v1116_v24 }
 0x339   : > { %v1124_v6 = vsel %vm1123_vm2, %v1119_v27, %v1122_v30 }
 0x33e   : > { %v1110_v29 = vpop.xlane.xlu1 %1109 }
 0x33f   : > { %v1120_v57 = vperm.slane %v1110_v29, %v1116_v24 }
 0x341   : > { %v1126_v31 = vsel %vm1125_vm4, %v1120_v57, %v1124_v6 }
 0x342   : > { %v1129_v32 = vsel %vm1128_vm3, %v1126_v31, 0.0 }
 0x343   : > { %1130 = vadd.xlane.f32.xlu2 %v1129_v32 }
 0x35b   : > { %1148 = vrot.lane.b32.xlu2 %v1147_v39, %s1651_s26 }
 0x3b6   : > { %v1131_v41 = vpop.xlane.xlu2 %1130 }
 0x3b7   : > { %v1132_v42 = vmul.f32 0.027777778, %v1131_v41 }
 0x3be   : > { %v1149_v43 = vpop.permute.xlu2 %1148 }
 0x3bf   : > { %v1151_v44 = vadd.f32 %v1149_v43, %v1132_v42 }
 0x3c1   : > { %1154 = vperm.xlu2 %1437, %v1151_v44  }
 0x41b   : > { %v1155_v12 = vpop.permute.xlu2 %1154 }
 0x41c   : > { %1157 = vst [vmem:[%s292_s13] sm:$0xf] %v1155_v12 }
 0x41d   : > { %1594 = shalt.err (!%p1591_p5)
}
 0x41e   : > { %1373 = dma.vmem_to_hbm [thread:$0]  (%p1730_p11), %s1172_s5, 64, %s1174_s30, %s1159_s7  }
 0x41f PF: > { %s1185_s20 = sand.u32 1, %s1633_s15   ;;  %p2075_p9 = scmp.ge.s32.totalorder %s1645_s18, 2 }
 0x420   : > { %s1186_s22 = scalar_lea.sflag [#allocation4], %s1185_s20 }
 0x421   : > { %p1390_p10 = pnand %p2075_p9, %p1734_p12 }
 0x423   : > { %p1391_p1 = pneg %p1390_p10 }
 0x425   : > { %1628 = dma.done.wait (%p1391_p1), %s1186_s22, 64  }
 0x426   : > { %1630 = vsyncadd (%p1391_p1), %s1186_s22, 4294967232  ;;  %s2076_s23 = sld [smem:[#allocation16_spill]]  ;;  %p21_p2 = scmp.ge.s32.totalorder %s1703_s21, 4  }
 0x427   : > { %s2077_s15 = smov %s1637_s16  ;;  %s2078_s16 = smov %s1641_s17 }
 0x428   : > { %s2080_s18 = smov %s1703_s21  ;;  %23 = sbr.rel (!%p21_p2) target bundleno = 11 (0xb), region = 102 }
 0x42c   : > { %s2079_s17 = smov %s2076_s23 }
 0x42d   :  { %1192 = vsyncpa [#allocation3], 1 }
 0x42e   :  { %1194 = vsyncpa [#allocation3 + $0x1], 1 }
 0x42f   :  { %1195 = vsyncpa [#allocation6], 1 }
 0x430   :  { %1197 = vsyncpa [#allocation6 + $0x1], 1 }
 0x431   :  { %1198 = vsyncpa [#allocation9], 1 }
 0x432   :  { %1199 = vsyncpa [#allocation4], 1 }
 0x433   :  { %1201 = vsyncpa [#allocation4 + $0x1], 1 }

</bundles_post_ra>
